<compile_context>
chip_gen: v6e
topology: v6e:2x2x1
jax: 0.10.0
libtpu: 0.0.40
codegen_flags: <defaults>
</compile_context>

<pallas_src>
import math
import functools

import jax
import jax.numpy as jnp
from jax.experimental import pallas as pl
from jax.experimental.pallas import tpu as pltpu


def make_positional_encoding(d_model: int, max_len: int = 500) -> jnp.ndarray:
    """Deterministic sinusoidal PE table, shape (max_len, d_model). Pure JAX glue."""
    position = jnp.arange(max_len, dtype=jnp.float32)[:, None]                 # (max_len, 1)
    div_term = jnp.exp(
        jnp.arange(0, d_model, 2, dtype=jnp.float32) * (-math.log(10000.0) / d_model)
    )                                                                           # (d_model//2,)
    pe = jnp.zeros((max_len, d_model), dtype=jnp.float32)
    pe = pe.at[:, 0::2].set(jnp.sin(position * div_term))
    pe = pe.at[:, 1::2].set(jnp.cos(position * div_term))
    return pe


def _pick_tile(total: int, quantum: int, target: int) -> int:
    """Largest multiple of `quantum` <= target that divides `total`; else the full extent."""
    if total % quantum != 0 or total <= quantum:
        return total
    t = min(total, max(quantum, (target // quantum) * quantum))
    while total % t != 0:
        t -= quantum
    return t


def _mix32(x):
    # splitmix32 / murmur-style 32-bit finalizer (full avalanche). Only plain uint32
    # VPU ops, so it lowers on TPU hardware *and* in CPU interpret mode.
    x = x ^ (x >> 16)
    x = x * jnp.uint32(0x7FEB352D)
    x = x ^ (x >> 15)
    x = x * jnp.uint32(0x846CA68B)
    x = x ^ (x >> 16)
    return x


def _pe_dropout_kernel(seed_ref, x_ref, pe_ref, o_ref, *, p: float, total_cols: int):
    # Hot path: lane-dense broadcast add, (B_TILE, F_TILE) + (1, F_TILE).
    y = x_ref[...] + pe_ref[...]
    if p > 0.0:
        # Inverted dropout. RNG = hash(seed, global element index): each tile gets a
        # unique, grid-invariant stream (no repeated masks across tiles).
        bt, ft = x_ref.shape
        fi = pl.program_id(0)          # feature-chunk index (outer grid axis)
        bi = pl.program_id(1)          # batch-chunk index   (inner grid axis)
        rows = jax.lax.broadcasted_iota(jnp.int32, (bt, ft), 0) + bi * bt
        cols = jax.lax.broadcasted_iota(jnp.int32, (bt, ft), 1) + fi * ft
        counter = (rows * total_cols + cols).astype(jnp.uint32)
        seed_u = seed_ref[0].astype(jnp.uint32)
        h = _mix32(counter + seed_u * jnp.uint32(0x9E3779B9))
        # Integer threshold compare on the top 31 bits (signed-safe): keep w.p. (1-p).
        r = (h >> 1).astype(jnp.int32)
        thr = jnp.int32(min(int(round(p * (1 << 31))), (1 << 31) - 1))
        keep = r >= thr
        y = jnp.where(keep, y * jnp.float32(1.0 / (1.0 - p)), jnp.zeros_like(y))
    o_ref[...] = y.astype(o_ref.dtype)


def positional_encoding_forward(x, pe, *, dropout_p=0.1, training=True, seed=0):
    """x: (B, S, D); pe: (max_len, D). Matches PyTorch: dropout(x + pe[:, :S, :])."""
    B, S, D = x.shape
    p = float(dropout_p) if training else 0.0

    # Lane-dense layout: flatten (S, D) -> F = S*D so the last (lane) dim is a multiple
    # of 128 whenever possible; D=32 alone would leave 75% of lanes masked per store.
    F = S * D
    x2 = x.reshape(B, F)
    pe2 = pe[:S, :].reshape(1, F).astype(x.dtype)

    # Tile sizes: lane dim in multiples of 128 (or full extent), batch in multiples of 8
    # (or full). Each block is capped around ~1 MiB so the default double-buffered
    # pipeline stays far below the 32 MiB scoped-VMEM default (safe on v7x's 64 MiB too).
    f_tile = _pick_tile(F, 128, 4096)
    bytes_per_row = f_tile * x.dtype.itemsize
    b_tile = _pick_tile(B, 8, max(8, (1 << 20) // max(1, bytes_per_row)))

    # Feature-chunks outer, batch-chunks inner: the PE block index only depends on the
    # outer axis, so the PE tile stays resident in VMEM across the whole batch loop.
    grid = (F // f_tile, B // b_tile)

    kernel = functools.partial(_pe_dropout_kernel, p=p, total_cols=F)
    seed_arr = jnp.array([seed], dtype=jnp.int32)

    out2 = pl.pallas_call(
        kernel,
        out_shape=jax.ShapeDtypeStruct((B, F), x.dtype),
        grid_spec=pltpu.PrefetchScalarGridSpec(
            num_scalar_prefetch=1,                       # seed lands in SMEM
            grid=grid,
            in_specs=[
                pl.BlockSpec((b_tile, f_tile), lambda f, b, seed: (b, f)),
                pl.BlockSpec((1, f_tile), lambda f, b, seed: (0, f)),  # PE: ignores batch
            ],
            out_specs=pl.BlockSpec((b_tile, f_tile), lambda f, b, seed: (b, f)),
        ),
        compiler_params=pltpu.CompilerParams(
            dimension_semantics=("parallel", "parallel"),   # lets v7x use both TCs
        ),
    )(seed_arr, x2, pe2)
    return out2.reshape(B, S, D)


if __name__ == "__main__":
    d_model = 32
    max_len = 500
    B, S = 2, 8

    key = jax.random.PRNGKey(0)
    x = jax.random.normal(key, (B, S, d_model), dtype=jnp.float32)
    pe = make_positional_encoding(d_model, max_len)
    ref = x + pe[None, :S, :]

    # Eval-mode pass (dropout = identity) -> must equal x + pe.
    out_eval = jax.block_until_ready(
        positional_encoding_forward(x, pe, dropout_p=0.1, training=False))
    assert out_eval.shape == (B, S, d_model)
    assert jnp.allclose(out_eval, ref, atol=1e-6), "eval-mode mismatch"

    # Training-mode pass (inverted dropout inside the kernel).
    # TODO(synk): RNG stream differs from torch's dropout; semantics (Bernoulli keep
    # prob 1-p, scale 1/(1-p)) match.
    p = 0.1
    out_train = jax.block_until_ready(
        positional_encoding_forward(x, pe, dropout_p=p, training=True, seed=1234))
    assert out_train.shape == (B, S, d_model)
    scaled = ref / (1.0 - p)
    ok = jnp.isclose(out_train, scaled, atol=1e-5) | (out_train == 0.0)
    assert bool(jnp.all(ok)), "training-mode values are not in {0, (x+pe)/(1-p)}"

    print("KERNEL_OK")
</pallas_src>

<mosaic_0001>
module attributes {stable_mosaic.version = 11 : i64} {
  func.func @_pe_dropout_kernel(%arg0: i32, %arg1: i32, %arg2: memref<1xi32, #tpu.memory_space<smem>>, %arg3: memref<2x256xf32, #tpu.memory_space<vmem>>, %arg4: memref<1x256xf32, #tpu.memory_space<vmem>>, %arg5: memref<2x256xf32, #tpu.memory_space<vmem>>) attributes {dimension_semantics = [#tpu.dimension_semantics<parallel>, #tpu.dimension_semantics<parallel>], iteration_bounds = array<i64: 1, 1>, scalar_prefetch = 1 : i64, scratch_operands = 0 : i64, tpu.core_type = #tpu.core_type<tc>, window_params = [{transform_indices = @transform_0, window_bounds = array<i64: 2, 256>}, {transform_indices = @transform_1, window_bounds = array<i64: 1, 256>}, {transform_indices = @transform_2, window_bounds = array<i64: 2, 256>}]} {
    %c0 = arith.constant 0 : index
    %c0_0 = arith.constant 0 : index
    %0 = vector.load %arg3[%c0, %c0_0] : memref<2x256xf32, #tpu.memory_space<vmem>>, vector<2x256xf32>
    %c0_1 = arith.constant 0 : index
    %c0_2 = arith.constant 0 : index
    %1 = vector.load %arg4[%c0_1, %c0_2] : memref<1x256xf32, #tpu.memory_space<vmem>>, vector<1x256xf32>
    %2 = vector.broadcast %1 : vector<1x256xf32> to vector<2x256xf32>
    %3 = arith.addf %0, %2 : vector<2x256xf32>
    %c0_3 = arith.constant 0 : index
    %c0_4 = arith.constant 0 : index
    %4 = vector.load %arg5[%c0_3, %c0_4] : memref<2x256xf32, #tpu.memory_space<vmem>>, vector<2x256xf32>
    tpu.vector_store %arg5[%c0_3, %c0_4], %3 {strides = array<i32>} : memref<2x256xf32, #tpu.memory_space<vmem>>, vector<2x256xf32>,
    return
  }
  func.func @transform_0(%arg0: i32, %arg1: i32, %arg2: memref<1xi32, #tpu.memory_space<smem>>) -> (i32, i32) {
    %c0_i32 = arith.constant 0 : i32
    return %arg1, %arg0 : i32, i32
  }
  func.func @transform_1(%arg0: i32, %arg1: i32, %arg2: memref<1xi32, #tpu.memory_space<smem>>) -> (i32, i32) {
    %c0_i32 = arith.constant 0 : i32
    %c0_i32_0 = arith.constant 0 : i32
    return %c0_i32, %arg0 : i32, i32
  }
  func.func @transform_2(%arg0: i32, %arg1: i32, %arg2: memref<1xi32, #tpu.memory_space<smem>>) -> (i32, i32) {
    %c0_i32 = arith.constant 0 : i32
    return %arg1, %arg0 : i32, i32
  }
}

</mosaic_0001>

<bundles_post_ra>
// kernel: tpu_custom_call.1
= control target key start
LH: loop header
LB: loop body
LE: loop exit
PB: predicated region body
PF: predicated region fallthrough
CT: control target
= control target key end

     0   :  { %9 = vsyncpa [#allocation5], 0  ;;  %s142_s0 = inlined_call_operand.<no memory space> [shape: s32[1], index: 0, kind: input, shape index: {}]   ;;  %s143_s1 = inlined_call_operand.hbm [shape: f32[2,256], index: 1, kind: input, shape index: {}]   ;;  %s144_s2 = inlined_call_operand.vmem [shape: f32[1,256], index: 2, kind: input, shape index: {}]   ;;  %s145_s3 = inlined_call_operand.hbm [shape: f32[2,256], index: 3, kind: output, shape index: {}]  }
   0x1   :  { %10 = vsyncpa [#allocation6], 0  ;;  %s110_s12 = smov [#allocation4]  }
   0x2   :  { %s17_s13 = sshll.u32 %s110_s12, 4  ;;  %s18_s13 = int_to_ptr.vmem [resolvable:$true] %s17_s13 }
   0x3   :  { %s74_s14 = scalar_lea.vmem %s18_s13, 64  ;;  %p79_p1 = scmp.lt.s32.totalorder %s18_s13, %s18_s13 }
   0x4   :  { %p75_p0 = scmp.ne.s32.totalorder %s18_s13, %s74_s14  ;;  %p80_p2 = scmp.lt.s32.totalorder %s74_s14, %s74_s14 }
   0x6   :  { %p81_p3 = por %p80_p2, %p79_p1 }
   0x8   :  { %p82_p4 = pnand %p81_p3, %p75_p0 }
   0xa   :  { %85 = shalt.err (!%p82_p4)
}
   0xb   :  { %20 = dma.hbm_to_vmem [thread:$0]  %s143_s1, 64, %s18_s13, [#allocation5]  }
   0xc   :  { %106 = dma.done.wait [#allocation5], 64  }
   0xd   :  { %107 = vsyncadd [#allocation5], 4294967232  ;;  %v29_v0 = vlaneseq  ;;  %v111_v1 = vmov 1983009808   ;;  %v27_v7 = vld [vmem:[%s144_s2] sm:$0x3] }
   0xe   :  { %v39_v2 = vunpack.c.l.s4 %v111_v1  ;;  %v26_v12 = vld [vmem:[#allocation4] sm:$0xf]  ;;  %s112_s18 = smov [#allocation7]  }
   0xf   :  { %v30_v3 = vshrl.u32 %v29_v0, 7  ;;  %s54_s1 = sshll.u32 %s112_s18, 4  ;;  %s55_s1 = int_to_ptr.vmem [resolvable:$true] %s54_s1 }
  0x10   :  { %v40_v6 = vunpack.c.0.s8 %v39_v2  ;;  %s86_s19 = scalar_lea.vmem %s55_s1, 64  ;;  %p91_p6 = scmp.lt.s32.totalorder %s55_s1, %s55_s1 }
  0x11   :  { %v31_v4 = vsub.s32 0, %v30_v3  ;;  %v35_v5 = vsub.s32 1, %v30_v3  ;;  %p87_p5 = scmp.ne.s32.totalorder %s55_s1, %s86_s19  ;;  %p92_p7 = scmp.lt.s32.totalorder %s86_s19, %s86_s19 }
  0x12   :  { %v43_v10 = vsub.s32 %v40_v6, %v30_v3 }
  0x13   :  { %v32_v8 = vrot.slane %v27_v7, %v31_v4  ;;  %v36_v9 = vrot.slane %v27_v7, %v35_v5  ;;  %p93_p8 = por %p92_p7, %p91_p6 }
  0x15   :  { %v37_v11 = vcombine.low %v32_v8, %v36_v9  ;;  %p94_p9 = pnand %p93_p8, %p87_p5 }
  0x17   :  { %v44_v13 = vrot.slane %v37_v11, %v43_v10 }
  0x19   :  { %v46_v14 = vadd.f32 %v44_v13, %v26_v12 }
  0x1b   :  { %47 = vst [vmem:[#allocation7] sm:$0xf] %v46_v14 }
  0x1c   :  { %97 = shalt.err (!%p94_p9)
}
  0x1d   :  { %57 = dma.vmem_to_hbm [thread:$0]  %s55_s1, 64, %s145_s3, [#allocation6]  }
  0x1e   :  { %108 = dma.done.wait [#allocation6], 64  }
  0x1f   :  { %109 = vsyncadd [#allocation6], 4294967232 }
  0x20   :  { %61 = vsyncpa [#allocation5], 1 }
  0x21   :  { %62 = vsyncpa [#allocation6], 1 }

</bundles_post_ra>
